<compile_context>
chip_gen: v5e
topology: v5e:2x2
jax: 0.10.0
libtpu: 0.0.40
codegen_flags: <defaults>
</compile_context>

<pallas_src>
import jax
import jax.numpy as jnp
from jax.experimental import pallas as pl
from jax.experimental.pallas import tpu as pltpu


def _mlp_kernel(x_ref, w1_ref, b1_ref, w2_ref, b2_ref, w3t_ref, b3_ref, o_ref):
    # Whole forward pass for one batch tile; weights/biases are VMEM-resident.
    x = x_ref[...]

    h1 = jnp.dot(x, w1_ref[...], preferred_element_type=jnp.float32) + b1_ref[...]
    h1 = jnp.maximum(h1, 0.0)                       # ReLU

    h2 = jnp.dot(h1, w2_ref[...], preferred_element_type=jnp.float32) + b2_ref[...]
    h2 = jnp.maximum(h2, 0.0)                       # ReLU

    # fc3 (out_features == 1): multiply by the (1, 32) weight row and reduce over lanes.
    z = jnp.sum(h2 * w3t_ref[...], axis=-1, keepdims=True) + b3_ref[...]
    o_ref[...] = jax.nn.sigmoid(z)                  # (tile_b, 1) store


def _round_up(n, m):
    return ((n + m - 1) // m) * m


@jax.jit
def feedforward_nn(x, w1, b1, w2, b2, w3, b3):
    B, in_dim = x.shape
    h1_dim = w1.shape[1]
    h2_dim = w2.shape[1]
    out_dim = w3.shape[1]          # == 1

    # Batch tile: large enough to amortize the ~0.35 us/step pipeline overhead, capped by
    # a conservative VMEM budget (double-buffered x/out tiles + f32 intermediates), and
    # ~cdiv(B, 2) so the parallel grid has >= 2 steps for v7x megacore at moderate batch.
    row_bytes = 4 * (2 * in_dim + h1_dim + h2_dim + 4 * out_dim + 8)
    cap = max(8, ((8 * 1024 * 1024) // row_bytes) // 8 * 8)
    tile_b = max(8, min(cap, _round_up(pl.cdiv(B, 2), 8)))
    grid = (pl.cdiv(B, tile_b),)

    # fc3 weight as a (1, h2_dim) row vector for the in-kernel multiply-reduce.
    w3t = w3.T

    def resident(a):
        # Same block every grid step -> DMA'd once, stays VMEM-resident.
        return pl.BlockSpec(a.shape, lambda i: (0, 0))

    out = pl.pallas_call(
        _mlp_kernel,
        out_shape=jax.ShapeDtypeStruct((B, out_dim), jnp.float32),
        grid=grid,
        in_specs=[
            pl.BlockSpec((tile_b, in_dim), lambda i: (i, 0)),   # x: tiled over batch
            resident(w1), resident(b1),                         # fc1
            resident(w2), resident(b2),                         # fc2
            resident(w3t), resident(b3),                        # fc3
        ],
        out_specs=pl.BlockSpec((tile_b, out_dim), lambda i: (i, 0)),
        compiler_params=pltpu.CompilerParams(
            dimension_semantics=("parallel",),   # megacore sharding on v7x
        ),
    )(x, w1, b1, w2, b2, w3t, b3)

    return out


def init_params(key, input_size):
    """Deterministic init matching nn.Linear's U(-1/sqrt(fan_in), 1/sqrt(fan_in))."""
    dims = [(input_size, 64), (64, 32), (32, 1)]
    params = []
    for i, (fan_in, fan_out) in enumerate(dims):
        kw, kb = jax.random.split(jax.random.fold_in(key, i))
        bound = 1.0 / jnp.sqrt(fan_in)
        w = jax.random.uniform(kw, (fan_in, fan_out), jnp.float32, -bound, bound)
        b = jax.random.uniform(kb, (1, fan_out), jnp.float32, -bound, bound)
        params += [w, b]
    return params


def reference(x, w1, b1, w2, b2, w3, b3):
    h1 = jnp.maximum(x @ w1 + b1, 0.0)
    h2 = jnp.maximum(h1 @ w2 + b2, 0.0)
    return jax.nn.sigmoid(h2 @ w3 + b3)


if __name__ == "__main__":
    key = jax.random.PRNGKey(0)
    k_x, k_p = jax.random.split(key)

    batch, input_size = 32, 16          # small shapes; 2 grid steps exercise the pipeline
    x = jax.random.normal(k_x, (batch, input_size), jnp.float32)
    params = init_params(k_p, input_size)

    out = feedforward_nn(x, *params)
    jax.block_until_ready(out)

    ref = reference(x, *params)
    assert out.shape == (batch, 1), out.shape
    assert jnp.allclose(out, ref, atol=1e-5, rtol=1e-5)

    print("KERNEL_OK")
</pallas_src>

<mosaic_0001>
module attributes {stable_mosaic.version = 11 : i64} {
  func.func @_mlp_kernel(%arg0: i32, %arg1: memref<16x16xf32, #tpu.memory_space<vmem>>, %arg2: memref<16x64xf32, #tpu.memory_space<vmem>>, %arg3: memref<1x64xf32, #tpu.memory_space<vmem>>, %arg4: memref<64x32xf32, #tpu.memory_space<vmem>>, %arg5: memref<1x32xf32, #tpu.memory_space<vmem>>, %arg6: memref<1x32xf32, #tpu.memory_space<vmem>>, %arg7: memref<1x1xf32, #tpu.memory_space<vmem>>, %arg8: memref<16x1xf32, #tpu.memory_space<vmem>>) attributes {dimension_semantics = [#tpu.dimension_semantics<parallel>], iteration_bounds = array<i64: 2>, scalar_prefetch = 0 : i64, scratch_operands = 0 : i64, tpu.core_type = #tpu.core_type<tc>, window_params = [{transform_indices = @transform_0, window_bounds = array<i64: 16, 16>}, {pipeline_mode = #tpu.pipeline_mode<synchronous>, transform_indices = @transform_1, window_bounds = array<i64: 16, 64>}, {pipeline_mode = #tpu.pipeline_mode<synchronous>, transform_indices = @transform_2, window_bounds = array<i64: 1, 64>}, {pipeline_mode = #tpu.pipeline_mode<synchronous>, transform_indices = @transform_3, window_bounds = array<i64: 64, 32>}, {pipeline_mode = #tpu.pipeline_mode<synchronous>, transform_indices = @transform_4, window_bounds = array<i64: 1, 32>}, {pipeline_mode = #tpu.pipeline_mode<synchronous>, transform_indices = @transform_5, window_bounds = array<i64: 1, 32>}, {pipeline_mode = #tpu.pipeline_mode<synchronous>, transform_indices = @transform_6, window_bounds = array<i64: 1, 1>}, {transform_indices = @transform_7, window_bounds = array<i64: 16, 1>}]} {
    %c0 = arith.constant 0 : index
    %c0_0 = arith.constant 0 : index
    %0 = vector.load %arg1[%c0, %c0_0] : memref<16x16xf32, #tpu.memory_space<vmem>>, vector<16x16xf32>
    %c0_1 = arith.constant 0 : index
    %c0_2 = arith.constant 0 : index
    %1 = vector.load %arg2[%c0_1, %c0_2] : memref<16x64xf32, #tpu.memory_space<vmem>>, vector<16x64xf32>
    %cst = arith.constant dense<0.000000e+00> : vector<16x64xf32>
    %2 = tpu.matmul %0, %1, %cst {dimension_numbers = #tpu.dot_dimension_numbers<[1], [0], [0], [1], [0, 0, 1, 1], [], []>} : vector<16x16xf32>, vector<16x64xf32>, vector<16x64xf32> -> vector<16x64xf32>
    %c0_3 = arith.constant 0 : index
    %c0_4 = arith.constant 0 : index
    %3 = vector.load %arg3[%c0_3, %c0_4] : memref<1x64xf32, #tpu.memory_space<vmem>>, vector<1x64xf32>
    %4 = vector.broadcast %3 : vector<1x64xf32> to vector<16x64xf32>
    %5 = arith.addf %2, %4 : vector<16x64xf32>
    %cst_5 = arith.constant 0.000000e+00 : f32
    %6 = vector.broadcast %cst_5 : f32 to vector<16x64xf32>
    %7 = arith.maximumf %5, %6 : vector<16x64xf32>
    %c0_6 = arith.constant 0 : index
    %c0_7 = arith.constant 0 : index
    %8 = vector.load %arg4[%c0_6, %c0_7] : memref<64x32xf32, #tpu.memory_space<vmem>>, vector<64x32xf32>
    %cst_8 = arith.constant dense<0.000000e+00> : vector<16x32xf32>
    %9 = tpu.matmul %7, %8, %cst_8 {dimension_numbers = #tpu.dot_dimension_numbers<[1], [0], [0], [1], [0, 0, 1, 1], [], []>} : vector<16x64xf32>, vector<64x32xf32>, vector<16x32xf32> -> vector<16x32xf32>
    %c0_9 = arith.constant 0 : index
    %c0_10 = arith.constant 0 : index
    %10 = vector.load %arg5[%c0_9, %c0_10] : memref<1x32xf32, #tpu.memory_space<vmem>>, vector<1x32xf32>
    %11 = vector.broadcast %10 : vector<1x32xf32> to vector<16x32xf32>
    %12 = arith.addf %9, %11 : vector<16x32xf32>
    %cst_11 = arith.constant 0.000000e+00 : f32
    %13 = vector.broadcast %cst_11 : f32 to vector<16x32xf32>
    %14 = arith.maximumf %12, %13 : vector<16x32xf32>
    %c0_12 = arith.constant 0 : index
    %c0_13 = arith.constant 0 : index
    %15 = vector.load %arg6[%c0_12, %c0_13] : memref<1x32xf32, #tpu.memory_space<vmem>>, vector<1x32xf32>
    %16 = vector.broadcast %15 : vector<1x32xf32> to vector<16x32xf32>
    %17 = arith.mulf %14, %16 : vector<16x32xf32>
    %cst_14 = arith.constant dense<0.000000e+00> : vector<16xf32>
    %18 = vector.multi_reduction <add>, %17, %cst_14 [1] : vector<16x32xf32> to vector<16xf32>
    %19 = vector.shape_cast %18 : vector<16xf32> to vector<16x1xf32>
    %c0_15 = arith.constant 0 : index
    %c0_16 = arith.constant 0 : index
    %20 = vector.load %arg7[%c0_15, %c0_16] : memref<1x1xf32, #tpu.memory_space<vmem>>, vector<1x1xf32>
    %21 = vector.broadcast %20 : vector<1x1xf32> to vector<16x1xf32>
    %22 = arith.addf %19, %21 : vector<16x1xf32>
    %23 = arith.negf %22 : vector<16x1xf32>
    %24 = math.exp %23 : vector<16x1xf32>
    %cst_17 = arith.constant 1.000000e+00 : f32
    %25 = vector.broadcast %cst_17 : f32 to vector<16x1xf32>
    %26 = arith.addf %25, %24 : vector<16x1xf32>
    %27 = arith.divf %25, %26 : vector<16x1xf32>
    %c0_18 = arith.constant 0 : index
    %c0_19 = arith.constant 0 : index
    %28 = vector.load %arg8[%c0_18, %c0_19] : memref<16x1xf32, #tpu.memory_space<vmem>>, vector<16x1xf32>
    tpu.vector_store %arg8[%c0_18, %c0_19], %27 {strides = array<i32>} : memref<16x1xf32, #tpu.memory_space<vmem>>, vector<16x1xf32>,
    return
  }
  func.func @transform_0(%arg0: i32) -> (i32, i32) {
    %c0_i32 = arith.constant 0 : i32
    %c0_i32_0 = arith.constant 0 : i32
    return %arg0, %c0_i32 : i32, i32
  }
  func.func @transform_1(%arg0: i32) -> (i32, i32) {
    %c0_i32 = arith.constant 0 : i32
    %c0_i32_0 = arith.constant 0 : i32
    %c0_i32_1 = arith.constant 0 : i32
    return %c0_i32, %c0_i32_0 : i32, i32
  }
  func.func @transform_2(%arg0: i32) -> (i32, i32) {
    %c0_i32 = arith.constant 0 : i32
    %c0_i32_0 = arith.constant 0 : i32
    %c0_i32_1 = arith.constant 0 : i32
    return %c0_i32, %c0_i32_0 : i32, i32
  }
  func.func @transform_3(%arg0: i32) -> (i32, i32) {
    %c0_i32 = arith.constant 0 : i32
    %c0_i32_0 = arith.constant 0 : i32
    %c0_i32_1 = arith.constant 0 : i32
    return %c0_i32, %c0_i32_0 : i32, i32
  }
  func.func @transform_4(%arg0: i32) -> (i32, i32) {
    %c0_i32 = arith.constant 0 : i32
    %c0_i32_0 = arith.constant 0 : i32
    %c0_i32_1 = arith.constant 0 : i32
    return %c0_i32, %c0_i32_0 : i32, i32
  }
  func.func @transform_5(%arg0: i32) -> (i32, i32) {
    %c0_i32 = arith.constant 0 : i32
    %c0_i32_0 = arith.constant 0 : i32
    %c0_i32_1 = arith.constant 0 : i32
    return %c0_i32, %c0_i32_0 : i32, i32
  }
  func.func @transform_6(%arg0: i32) -> (i32, i32) {
    %c0_i32 = arith.constant 0 : i32
    %c0_i32_0 = arith.constant 0 : i32
    %c0_i32_1 = arith.constant 0 : i32
    return %c0_i32, %c0_i32_0 : i32, i32
  }
  func.func @transform_7(%arg0: i32) -> (i32, i32) {
    %c0_i32 = arith.constant 0 : i32
    %c0_i32_0 = arith.constant 0 : i32
    return %arg0, %c0_i32 : i32, i32
  }
}

</mosaic_0001>

<bundles_post_ra>
// kernel: feedforward_nn.1
= control target key start
LH: loop header
LB: loop body
LE: loop exit
PB: predicated region body
PF: predicated region fallthrough
CT: control target
= control target key end

     0   :  { %s580_s26 = smov 0   ;;  %s645_s0 = inlined_call_operand.vmem [shape: f32[32,16], index: 0, kind: input, shape index: {}]   ;;  %s646_s1 = inlined_call_operand.vmem [shape: f32[16,64], index: 1, kind: input, shape index: {}]   ;;  %s647_s2 = inlined_call_operand.vmem [shape: f32[1,64], index: 2, kind: input, shape index: {}]   ;;  %s648_s3 = inlined_call_operand.vmem [shape: f32[64,32], index: 3, kind: input, shape index: {}]   ;;  %s649_s4 = inlined_call_operand.vmem [shape: f32[1,32], index: 4, kind: input, shape index: {}]   ;;  %s650_s5 = inlined_call_operand.vmem [shape: f32[1,32], index: 5, kind: input, shape index: {}]   ;;  %s651_s6 = inlined_call_operand.<no memory space> [shape: f32[1,1], index: 6, kind: input, shape index: {}]   ;;  %s652_s7 = inlined_call_operand.vmem [shape: f32[32,1], index: 7, kind: output, shape index: {}]  }
   0x1   :  { %v12_v0 = vstv %s651_s6 }
   0x2   :  { %13 = vst [vmem:[#allocation2] sm:$0x1] %v12_v0 }
   0x3 LB: > { %s484_s27 = sadd.s32 4294967295, %s535_s26   ;;  %p488_p0 = scmp.ge.s32.totalorder %s535_s26, 1  ;;  %s535_s26 = sphi %s580_s26, %s19_s26  }
   0x4   : > { %p240_p1 = scmp.lt.s32.totalorder %s535_s26, 3 }
   0x6   : > { %p241_p2 = pnand %p488_p0, %p240_p1 }
   0x7   : > { %s489_s8 = sshll.u32 (!%p241_p2), %s484_s27, 1 }
   0x8   : > { %244 = sbr.rel (%p241_p2) target bundleno = 441 (0x1b9), region = 48  ;;  %p273_p3 = scmp.lt.s32.totalorder (!%p241_p2), %s489_s8, 3 }
   0xd   : > { %v287_v1 = vld [vmem:[%s646_s1 + $0x8] sm:$0xff]  ;;  %v286_v2 = vld [vmem:[%s646_s1] sm:$0xff]  ;;  %v331_v3 = vld [vmem:[%s648_s3 + $0x38] sm:$0xff]  ;;  %s654_s8 = smov (!%p273_p3, %s489_s8), 3  ;;  %vm292_vm0 = vcmask 130048   ;;  %vm336_vm1 = vcmask 523264  }
   0xe   : > { %313 = vmatpush.msra.mxu0 %v287_v1  ;;  %351 = vmatpush.msra.mxu1 %v331_v3  ;;  %v330_v4 = vld [vmem:[%s648_s3 + $0x30] sm:$0xff]  ;;  %v329_v5 = vld [vmem:[%s648_s3 + $0x28] sm:$0xff]  ;;  %v328_v6 = vld [vmem:[%s648_s3 + $0x20] sm:$0xff]  ;;  %s490_s17 = sshll.u32 %s654_s8, 3  ;;  %vm374_vm2 = vcmask 261120   ;;  %vm425_vm5 = vcmask 7168  }
   0xf   : > { %501 = vmatpush.msra.mxu2 %v331_v3  ;;  %s276_s20 = scalar_lea.vmem %s645_s0, %s490_s17  ;;  %v327_v7 = vld [vmem:[%s648_s3 + $0x18] sm:$0xff]  ;;  %v326_v10 = vld [vmem:[%s648_s3 + $0x10] sm:$0xff]  ;;  %v325_v11 = vld [vmem:[%s648_s3 + $0x8] sm:$0xff]  ;;  %s282_s15 = scalar_lea.vmem %s652_s7, %s490_s17 }
  0x10   : > { %314 = vmatpush.msra.mxu0 %v286_v2  ;;  %352 = vmatpush.msra.mxu1 %v330_v4  ;;  %v284_v8 = vld [vmem:[%s276_s20] sm:$0xff]  ;;  %v285_v9 = vld [vmem:[%s276_s20 + $0x8] sm:$0xff] }
  0x11   : > { %502 = vmatpush.msra.mxu2 %v330_v4  ;;  %493 = vmatmul.msk.f32.vlgmr.msra.gmra.mxu0 %vm292_vm0, %v284_v8  ;;  %v324_v12 = vld [vmem:[%s648_s3] sm:$0xff] }
  0x12   : > { %353 = vmatpush.msra.mxu1 %v329_v5  ;;  %v517_v13 = vld [vmem:[%s647_s2] ss:$0 sm:$0xff] }
  0x13   : > { %503 = vmatpush.msra.mxu2 %v329_v5  ;;  %v518_v20 = vld [vmem:[%s649_s4] ss:$0 sm:$0xff] }
  0x14   : > { %354 = vmatpush.msra.mxu1 %v328_v6  ;;  %v519_v23 = vld [vmem:[%s650_s5] ss:$0 sm:$0xff] }
  0x15   : > { %504 = vmatpush.msra.mxu2 %v328_v6  ;;  %v520_v32 = vld [vmem:[#allocation2] ss:$0 sm:$0xff] }
  0x16   : > { %355 = vmatpush.msra.mxu1 %v327_v7 }
  0x17   : > { %505 = vmatpush.msra.mxu2 %v327_v7 }
  0x18   : > { %356 = vmatpush.msra.mxu1 %v326_v10 }
  0x19   : > { %494 = vmatmul.msk.f32.gmra.mxu0 %vm292_vm0, %v285_v9  ;;  %506 = vmatpush.msra.mxu2 %v326_v10 }
  0x1a   : > { %357 = vmatpush.msra.mxu1 %v325_v11 }
  0x1b   : > { %507 = vmatpush.msra.mxu2 %v325_v11 }
  0x1c   : > { %358 = vmatpush.msra.mxu1 %v324_v12 }
  0x1d   : > { %508 = vmatpush.msra.mxu2 %v324_v12 }
  0x8e   : > { %v316_v14 = vpop.f32.mrf.mxu0 }
  0x8f   : > { %v317_v15 = vadd.f32 %v517_v13, %v316_v14 }
  0x91   : > { %v322_v16 = vmax.f32 %v317_v15, 0.0 }
  0x93   : > { %495 = vmatmul.msk.f32.vlgmr.msra.gmra.mxu1 %vm336_vm1, %v322_v16 }
  0x96   : > { %v319_v17 = vpop.f32.mrf.mxu0 }
  0x97   : > { %v320_v18 = vadd.f32 %v517_v13, %v319_v17 }
  0x99   : > { %v323_v19 = vmax.f32 %v320_v18, 0.0 }
  0x9b   : > { %496 = vmatmul.msk.f32.vlgmr.msra.gmra.mxu2 %vm336_vm1, %v323_v19 }
 0x110   : > { %v360_v21 = vpop.f32.mrf.mxu1 }
 0x111   : > { %v361_v22 = vadd.f32 %v518_v20, %v360_v21 }
 0x113   : > { %v366_v24 = vmax.f32 %v361_v22, 0.0 }
 0x115   : > { %v372_v25 = vmul.f32 %v519_v23, %v366_v24 }
 0x117   : > { %v375_v26 = vsel %vm374_vm2, %v372_v25, 0.0 }
 0x118   : > { %376 = vadd.xlane.f32.xlu0 %v375_v26 }
 0x11e   : > { %v363_v27 = vpop.f32.mrf.mxu2 }
 0x11f   : > { %v364_v28 = vadd.f32 %v518_v20, %v363_v27 }
 0x121   : > { %v367_v29 = vmax.f32 %v364_v28, 0.0 }
 0x123   : > { %v373_v30 = vmul.f32 %v519_v23, %v367_v29 }
 0x125   : > { %v378_v31 = vsel %vm374_vm2, %v373_v30, 0.0 }
 0x126   : > { %379 = vadd.xlane.f32.xlu0 %v378_v31 }
 0x18b   : > { %v377_v33 = vpop.xlane.xlu0 %376 }
 0x18c   : > { %v385_v34 = vadd.f32 %v520_v32, %v377_v33 }
 0x18e   : > { %v497_v35 = vmul.f32 -1.442695, %v385_v34 }
 0x190   : > { %521 = vpow2.f32 %v497_v35 }
 0x196   : > { %v522_v36 = vpop.eup %521 }
 0x197   : > { %v393_v37 = vadd.f32 1.0, %v522_v36 }
 0x199   : > { %523 = vrcp.f32 %v393_v37  ;;  %v380_v38 = vpop.xlane.xlu0 %379  ;;  %v406_v44 = vand.u32 2147483648, %v393_v37  ;;  %v404_v47 = vand.u32 2147483647, %v393_v37  ;;  %vm400_vm4 = vweird.f32 %v393_v37 }
 0x19a   : > { %v386_v39 = vadd.f32 %v520_v32, %v380_v38 }
 0x19b   : > { %v407_v50 = vor.u32 1.1754944e-38, %v406_v44  ;;  %vm405_vm7 = vcmp.eq.f32.partialorder %v404_v47, 8.507059e+37 }
 0x19c   : > { %v498_v40 = vmul.f32 -1.442695, %v386_v39 }
 0x19e   : > { %525 = vpow2.f32 %v498_v40 }
 0x19f   : > { %v524_v41 = vpop.eup %523 }
 0x1a0   : > { %v396_v42 = vmul.f32 %v524_v41, %v393_v37  ;;  %vm401_vm3 = vweird.f32 %v524_v41 }
 0x1a1   : > { %vm402_vm6 = vmor %vm400_vm4, %vm401_vm3 }
 0x1a2   : > { %v397_v43 = vsub.f32 1.0, %v396_v42 }
 0x1a4   : > { %v526_v45 = vpop.eup %525  ;;  %v398_v46 = vmul.f32 %v524_v41, %v397_v43 }
 0x1a5   : > { %v394_v48 = vadd.f32 1.0, %v526_v45 }
 0x1a6   : > { %v399_v49 = vadd.f32 %v524_v41, %v398_v46 }
 0x1a7   : > { %527 = vrcp.f32 %v394_v48  ;;  %v421_v56 = vand.u32 2147483648, %v394_v48  ;;  %v419_v58 = vand.u32 2147483647, %v394_v48  ;;  %vm415_vm9 = vweird.f32 %v394_v48 }
 0x1a8   : > { %v403_v51 = vsel %vm402_vm6, %v524_v41, %v399_v49 }
 0x1a9   : > { %v408_v52 = vsel %vm405_vm7, %v407_v50, %v403_v51  ;;  %v422_v60 = vor.u32 1.1754944e-38, %v421_v56  ;;  %vm420_vm11 = vcmp.eq.f32.partialorder %v419_v58, 8.507059e+37 }
 0x1aa   : > { %426 = vst.msk [vmem:[%s282_s15] sm:$0xff] %vm425_vm5, %v408_v52 }
 0x1ad   : > { %v528_v53 = vpop.eup %527 }
 0x1ae   : > { %v411_v54 = vmul.f32 %v528_v53, %v394_v48  ;;  %vm416_vm8 = vweird.f32 %v528_v53 }
 0x1af   : > { %vm417_vm10 = vmor %vm415_vm9, %vm416_vm8 }
 0x1b0   : > { %v412_v55 = vsub.f32 1.0, %v411_v54 }
 0x1b2   : > { %v413_v57 = vmul.f32 %v528_v53, %v412_v55 }
 0x1b4   : > { %v414_v59 = vadd.f32 %v528_v53, %v413_v57 }
 0x1b6   : > { %v418_v61 = vsel %vm417_vm10, %v528_v53, %v414_v59 }
 0x1b7   : > { %v423_v62 = vsel %vm420_vm11, %v422_v60, %v418_v61 }
 0x1b8   : > { %427 = vst.msk [vmem:[%s282_s15 + $0x8] sm:$0xff] %vm425_vm5, %v423_v62 }
 0x1b9 PF: > { %s19_s26 = sadd.s32 1, %s535_s26  }
 0x1ba   : > { %p16_p4 = scmp.ge.s32.totalorder %s19_s26, 4  }
 0x1bc   :  { %18 = sbr.rel (!%p16_p4) target bundleno = 3 (0x3), region = 78 }

</bundles_post_ra>
